<compile_context>
chip_gen: v7x
topology: tpu7x:2x2x1
jax: 0.10.0
libtpu: 0.0.40
codegen_flags: <defaults>
</compile_context>

<pallas_src>
import functools

import jax
import jax.numpy as jnp
from jax.experimental import pallas as pl
from jax.experimental.pallas import tpu as pltpu

_LANES = 128


def _round_up(x, m):
    return ((x + m - 1) // m) * m


def _agree_disagree_kernel(scores_ref, labels_ref, out_ref, *,
                           margin, total_elems, block_rows, need_mask):
    """One grid step over a (block_rows, 128) tile of the interleaved layout.

    scores_ref: (block_rows, 128) scores; flat order is [s0, s1, s0, s1, ...]
                so even lanes carry scores[:, 0], odd lanes carry scores[:, 1].
    labels_ref: (block_rows, 128) int8 labels (repeated x2 to match).
    out_ref:    (1, 1, 128) f32 per-block per-lane partial sums.
    """
    s = scores_ref[...].astype(jnp.float32)
    lbl = labels_ref[...].astype(jnp.float32)

    relu = lambda x: jnp.maximum(x, 0.0)
    # Per-element contribution, split by which score column the element is:
    #   even lane (scores[:,0]): (1-l)*(1-s) + l*relu(s - m)
    #   odd  lane (scores[:,1]): (1-l)*relu(s - m) + l*(1-s)
    even_term = (1.0 - lbl) * (1.0 - s) + lbl * relu(s - margin)
    odd_term = (1.0 - lbl) * relu(s - margin) + lbl * (1.0 - s)
    lane = jax.lax.broadcasted_iota(jnp.int32, s.shape, 1)
    loss = jnp.where(lane % 2 == 0, even_term, odd_term)

    def _store(x):
        # Per-lane partial sums (lane-dense 128-wide store); the cross-lane /
        # cross-step reduction happens in the wrapper.
        out_ref[...] = jnp.sum(x, axis=0)[None, None, :]

    if need_mask:
        # Padded / ragged elements only ever live in the last grid step, so
        # only that step pays for the mask.
        pid = pl.program_id(0)
        last = pl.num_programs(0) - 1

        @pl.when(pid != last)
        def _():
            _store(loss)

        @pl.when(pid == last)
        def _():
            row = jax.lax.broadcasted_iota(jnp.int32, s.shape, 0)
            gidx = (pid * block_rows + row) * _LANES + lane
            _store(jnp.where(gidx < total_elems, loss, 0.0))
    else:
        _store(loss)


def agree_disagree_loss(scores, labels, margin=0.0, block_rows=2048):
    """Pallas equivalent of AgreeDisagreeLoss.forward.

    Args:
      scores: [B, 2] array of cosine similarities (f32 or bf16).
      labels: [B] array of 0/1 labels (any int/bool/float dtype).
      margin: python float, static.
      block_rows: rows (of 128 lanes each) per grid step; 2048 rows ≈ 1 MiB of
        f32 scores per step.  Bias larger on v7x if desired.

    Returns:
      scalar f32 mean loss.
    """
    B = scores.shape[0]
    E = 2 * B

    # Free layout change: (B, 2) row-major flattens to the interleaved vector
    # [s0_0, s1_0, s0_1, s1_1, ...] — no transpose / HBM relayout pass.
    flat_scores = scores.reshape(E)
    flat_labels = jnp.repeat(labels.astype(jnp.int8), 2)   # (E,) tiny int8 copy

    # Pad the flat length to a multiple of 128 only when needed (B % 64 != 0).
    e_pad = _round_up(E, _LANES)
    if e_pad != E:
        flat_scores = jnp.pad(flat_scores, (0, e_pad - E))
        flat_labels = jnp.pad(flat_labels, (0, e_pad - E))
    rows = e_pad // _LANES
    scores2d = flat_scores.reshape(rows, _LANES)
    labels2d = flat_labels.reshape(rows, _LANES)

    # Block rows: whole array for small inputs (block == full dim is always a
    # legal shape); otherwise a large multiple of 32 (covers f32/bf16/int8
    # sublane tiling) so ragged last blocks stay tile-aligned enough.
    br = min(int(block_rows), rows)
    if br < rows:
        br = _round_up(br, 32)
        if br >= rows:
            br = rows
    n_steps = (rows + br - 1) // br
    need_mask = (n_steps * br * _LANES) != E

    itemsize = jnp.dtype(scores.dtype).itemsize
    cost = pl.CostEstimate(
        flops=8 * E,
        transcendentals=0,
        bytes_accessed=e_pad * (itemsize + 1) + n_steps * _LANES * 4,
    )

    partials = pl.pallas_call(
        functools.partial(_agree_disagree_kernel,
                          margin=float(margin), total_elems=E,
                          block_rows=br, need_mask=need_mask),
        out_shape=jax.ShapeDtypeStruct((n_steps, 1, _LANES), jnp.float32),
        grid_spec=pltpu.PrefetchScalarGridSpec(
            num_scalar_prefetch=0,
            grid=(n_steps,),
            in_specs=[
                pl.BlockSpec((br, _LANES), lambda i: (i, 0)),   # scores tile
                pl.BlockSpec((br, _LANES), lambda i: (i, 0)),   # labels tile
            ],
            # Per-block, lane-dense partial sums: no shared accumulator, so the
            # grid axis can be truly parallel (both TensorCores on v7x).
            out_specs=pl.BlockSpec((1, 1, _LANES), lambda i: (i, 0, 0)),
        ),
        compiler_params=pltpu.CompilerParams(
            dimension_semantics=("parallel",)),
        cost_estimate=cost,
    )(scores2d, labels2d)

    # Tiny final reduction + mean over the *real* batch (1/B precomputed).
    return jnp.sum(partials) * (1.0 / B)


def _reference(scores, labels, margin=0.0):
    labels = labels.astype(jnp.float32)
    s0 = scores[:, 0].astype(jnp.float32)
    s1 = scores[:, 1].astype(jnp.float32)
    relu = lambda x: jnp.maximum(x, 0.0)
    loss = (1.0 - labels) * (1.0 - s0 + relu(s1 - margin)) \
         + labels * (relu(s0 - margin) + (1.0 - s1))
    return jnp.mean(loss)


if __name__ == "__main__":
    key = jax.random.PRNGKey(0)
    k_scores, k_labels = jax.random.split(key)

    # Small canonical test: batch=8, scores [8, 2].
    batch = 8
    scores = jax.random.uniform(k_scores, (batch, 2), jnp.float32,
                                minval=-1.0, maxval=1.0)
    labels = jax.random.bernoulli(k_labels, 0.5, (batch,)).astype(jnp.int8)

    loss = jax.block_until_ready(agree_disagree_loss(scores, labels, margin=0.0))
    ref = _reference(scores, labels, margin=0.0)
    assert jnp.allclose(loss, ref, atol=1e-6, rtol=1e-6), (loss, ref)

    # Multi-step grid + non-aligned batch (pad + ragged last block + mask),
    # nonzero margin.
    batch2 = 3000
    k2s, k2l = jax.random.split(jax.random.PRNGKey(1))
    scores2 = jax.random.uniform(k2s, (batch2, 2), jnp.float32,
                                 minval=-1.0, maxval=1.0)
    labels2 = jax.random.bernoulli(k2l, 0.5, (batch2,)).astype(jnp.int8)
    loss2 = jax.block_until_ready(
        agree_disagree_loss(scores2, labels2, margin=0.1, block_rows=32))
    ref2 = _reference(scores2, labels2, margin=0.1)
    assert jnp.allclose(loss2, ref2, atol=1e-5, rtol=1e-5), (loss2, ref2)

    # bf16 scores, aligned batch (no pad, no mask), multi-step grid.
    batch3 = 4096
    k3s, k3l = jax.random.split(jax.random.PRNGKey(2))
    scores3 = jax.random.uniform(k3s, (batch3, 2), jnp.float32,
                                 minval=-1.0, maxval=1.0).astype(jnp.bfloat16)
    labels3 = jax.random.bernoulli(k3l, 0.5, (batch3,)).astype(jnp.int32)
    loss3 = jax.block_until_ready(
        agree_disagree_loss(scores3, labels3, margin=0.0, block_rows=32))
    ref3 = _reference(scores3.astype(jnp.float32), labels3, margin=0.0)
    assert jnp.allclose(loss3, ref3, atol=1e-4, rtol=1e-4), (loss3, ref3)

    print("KERNEL_OK")
</pallas_src>

<mosaic_0001>
module attributes {stable_mosaic.version = 11 : i64} {
  func.func @_agree_disagree_kernel(%arg0: i32, %arg1: memref<1x128xf32, #tpu.memory_space<vmem>>, %arg2: memref<1x128xi8, #tpu.memory_space<vmem>>, %arg3: memref<1x1x128xf32, #tpu.memory_space<vmem>>) attributes {dimension_semantics = [#tpu.dimension_semantics<parallel>], iteration_bounds = array<i64: 1>, scalar_prefetch = 0 : i64, scratch_operands = 0 : i64, tpu.core_type = #tpu.core_type<tc>, window_params = [{transform_indices = @transform_0, window_bounds = array<i64: 1, 128>}, {transform_indices = @transform_1, window_bounds = array<i64: 1, 128>}, {transform_indices = @transform_2, window_bounds = array<i64: 1, 1, 128>}]} {
    %c0 = arith.constant 0 : index
    %c0_0 = arith.constant 0 : index
    %0 = vector.load %arg1[%c0, %c0_0] : memref<1x128xf32, #tpu.memory_space<vmem>>, vector<1x128xf32>
    %c0_1 = arith.constant 0 : index
    %c0_2 = arith.constant 0 : index
    %1 = vector.load %arg2[%c0_1, %c0_2] : memref<1x128xi8, #tpu.memory_space<vmem>>, vector<1x128xi8>
    %2 = arith.sitofp %1 : vector<1x128xi8> to vector<1x128xf32>
    %cst = arith.constant 1.000000e+00 : f32
    %3 = vector.broadcast %cst : f32 to vector<1x128xf32>
    %4 = arith.subf %3, %2 : vector<1x128xf32>
    %cst_3 = arith.constant 1.000000e+00 : f32
    %5 = vector.broadcast %cst_3 : f32 to vector<1x128xf32>
    %6 = arith.subf %5, %0 : vector<1x128xf32>
    %7 = arith.mulf %4, %6 : vector<1x128xf32>
    %cst_4 = arith.constant 0.000000e+00 : f32
    %8 = vector.broadcast %cst_4 : f32 to vector<1x128xf32>
    %9 = arith.subf %0, %8 : vector<1x128xf32>
    %cst_5 = arith.constant 0.000000e+00 : f32
    %10 = vector.broadcast %cst_5 : f32 to vector<1x128xf32>
    %11 = arith.maximumf %9, %10 : vector<1x128xf32>
    %12 = arith.mulf %2, %11 : vector<1x128xf32>
    %13 = arith.addf %7, %12 : vector<1x128xf32>
    %cst_6 = arith.constant 1.000000e+00 : f32
    %14 = vector.broadcast %cst_6 : f32 to vector<1x128xf32>
    %15 = arith.subf %14, %2 : vector<1x128xf32>
    %cst_7 = arith.constant 0.000000e+00 : f32
    %16 = vector.broadcast %cst_7 : f32 to vector<1x128xf32>
    %17 = arith.subf %0, %16 : vector<1x128xf32>
    %cst_8 = arith.constant 0.000000e+00 : f32
    %18 = vector.broadcast %cst_8 : f32 to vector<1x128xf32>
    %19 = arith.maximumf %17, %18 : vector<1x128xf32>
    %20 = arith.mulf %15, %19 : vector<1x128xf32>
    %cst_9 = arith.constant 1.000000e+00 : f32
    %21 = vector.broadcast %cst_9 : f32 to vector<1x128xf32>
    %22 = arith.subf %21, %0 : vector<1x128xf32>
    %23 = arith.mulf %2, %22 : vector<1x128xf32>
    %24 = arith.addf %20, %23 : vector<1x128xf32>
    %25 = tpu.iota {dimensions = array<i32: 1>} : vector<1x128xi32>
    %c2_i32 = arith.constant 2 : i32
    %c0_i32 = arith.constant 0 : i32
    %26 = arith.cmpi eq, %c2_i32, %c0_i32 : i32
    %c1_i32 = arith.constant 1 : i32
    %27 = arith.select %26, %c1_i32, %c2_i32 : i32
    %28 = vector.broadcast %27 : i32 to vector<1x128xi32>
    %29 = arith.remsi %25, %28 : vector<1x128xi32>
    %c0_i32_10 = arith.constant 0 : i32
    %30 = vector.broadcast %c0_i32_10 : i32 to vector<1x128xi32>
    %31 = arith.cmpi ne, %29, %30 : vector<1x128xi32>
    %c0_i32_11 = arith.constant 0 : i32
    %32 = vector.broadcast %c0_i32_11 : i32 to vector<1x128xi32>
    %33 = arith.cmpi slt, %29, %32 : vector<1x128xi32>
    %c0_i32_12 = arith.constant 0 : i32
    %34 = arith.cmpi slt, %27, %c0_i32_12 : i32
    %35 = vector.broadcast %34 : i1 to vector<1x128xi1>
    %36 = vector.broadcast %35 : vector<1x128xi1> to vector<1x128xi1>
    %37 = arith.xori %33, %36 : vector<1x128xi1>
    %38 = arith.andi %37, %31 : vector<1x128xi1>
    %39 = vector.broadcast %27 : i32 to vector<1x128xi32>
    %40 = arith.addi %29, %39 : vector<1x128xi32>
    %41 = arith.select %38, %40, %29 : vector<1x128xi1>, vector<1x128xi32>
    %c0_i32_13 = arith.constant 0 : i32
    %42 = vector.broadcast %c0_i32_13 : i32 to vector<1x128xi32>
    %43 = arith.cmpi eq, %41, %42 : vector<1x128xi32>
    %44 = arith.select %43, %13, %24 : vector<1x128xi1>, vector<1x128xf32>
    %c0_i32_14 = arith.constant 0 : i32
    %45 = arith.cmpi ne, %arg0, %c0_i32_14 : i32
    %46 = arith.extui %45 : i1 to i32
    %c0_i32_15 = arith.constant 0 : i32
    %47 = arith.cmpi ne, %46, %c0_i32_15 : i32
    scf.if %47 {
      %cst_18 = arith.constant dense<0.000000e+00> : vector<128xf32>
      %51 = vector.multi_reduction <add>, %44, %cst_18 [0] : vector<1x128xf32> to vector<128xf32>
      %52 = vector.shape_cast %51 : vector<128xf32> to vector<1x1x128xf32>
      %c0_19 = arith.constant 0 : index
      %c0_20 = arith.constant 0 : index
      %c0_21 = arith.constant 0 : index
      %53 = vector.load %arg3[%c0_19, %c0_20, %c0_21] : memref<1x1x128xf32, #tpu.memory_space<vmem>>, vector<1x1x128xf32>
      tpu.vector_store %arg3[%c0_19, %c0_20, %c0_21], %52 {strides = array<i32>} : memref<1x1x128xf32, #tpu.memory_space<vmem>>, vector<1x1x128xf32>,
    } else {
    }
    %c0_i32_16 = arith.constant 0 : i32
    %48 = arith.cmpi eq, %arg0, %c0_i32_16 : i32
    %49 = arith.extui %48 : i1 to i32
    %c0_i32_17 = arith.constant 0 : i32
    %50 = arith.cmpi ne, %49, %c0_i32_17 : i32
    scf.if %50 {
      %51 = tpu.iota {dimensions = array<i32: 0>} : vector<1x128xi32>
      %c1_i32_18 = arith.constant 1 : i32
      %52 = arith.muli %arg0, %c1_i32_18 : i32
      %53 = vector.broadcast %52 : i32 to vector<1x128xi32>
      %54 = arith.addi %53, %51 : vector<1x128xi32>
      %c128_i32 = arith.constant 128 : i32
      %55 = vector.broadcast %c128_i32 : i32 to vector<1x128xi32>
      %56 = arith.muli %54, %55 : vector<1x128xi32>
      %57 = arith.addi %56, %25 : vector<1x128xi32>
      %c16_i32 = arith.constant 16 : i32
      %58 = vector.broadcast %c16_i32 : i32 to vector<1x128xi32>
      %59 = arith.cmpi slt, %57, %58 : vector<1x128xi32>
      %cst_19 = arith.constant 0.000000e+00 : f32
      %60 = vector.broadcast %cst_19 : f32 to vector<1x128xf32>
      %61 = arith.select %59, %44, %60 : vector<1x128xi1>, vector<1x128xf32>
      %cst_20 = arith.constant dense<0.000000e+00> : vector<128xf32>
      %62 = vector.multi_reduction <add>, %61, %cst_20 [0] : vector<1x128xf32> to vector<128xf32>
      %63 = vector.shape_cast %62 : vector<128xf32> to vector<1x1x128xf32>
      %c0_21 = arith.constant 0 : index
      %c0_22 = arith.constant 0 : index
      %c0_23 = arith.constant 0 : index
      %64 = vector.load %arg3[%c0_21, %c0_22, %c0_23] : memref<1x1x128xf32, #tpu.memory_space<vmem>>, vector<1x1x128xf32>
      tpu.vector_store %arg3[%c0_21, %c0_22, %c0_23], %63 {strides = array<i32>} : memref<1x1x128xf32, #tpu.memory_space<vmem>>, vector<1x1x128xf32>,
    } else {
    }
    return
  }
  func.func @transform_0(%arg0: i32) -> (i32, i32) {
    %c0_i32 = arith.constant 0 : i32
    %c0_i32_0 = arith.constant 0 : i32
    return %arg0, %c0_i32 : i32, i32
  }
  func.func @transform_1(%arg0: i32) -> (i32, i32) {
    %c0_i32 = arith.constant 0 : i32
    %c0_i32_0 = arith.constant 0 : i32
    return %arg0, %c0_i32 : i32, i32
  }
  func.func @transform_2(%arg0: i32) -> (i32, i32, i32) {
    %c0_i32 = arith.constant 0 : i32
    %c0_i32_0 = arith.constant 0 : i32
    %c0_i32_1 = arith.constant 0 : i32
    return %arg0, %c0_i32, %c0_i32_0 : i32, i32, i32
  }
}

</mosaic_0001>

<bundles_post_ra>
// kernel: tpu_custom_call.1
= control target key start
LH: loop header
LB: loop body
LE: loop exit
PB: predicated region body
PF: predicated region fallthrough
CT: control target
= control target key end

     0   :  { %7 = vsyncpa [#allocation3], 0  ;;  %s182_s0 = inlined_call_operand.hbm [shape: f32[1,128], index: 0, kind: input, shape index: {}]   ;;  %s183_s1 = inlined_call_operand.vmem [shape: s8[1,128], index: 1, kind: input, shape index: {}]   ;;  %s184_s2 = inlined_call_operand.hbm [shape: f32[1,1,128], index: 2, kind: output, shape index: {}]  }
   0x1   :  { %8 = vsyncpa [#allocation4], 0  ;;  %s138_s9 = smov [#allocation2]   ;;  %s90_s13 = scalar_lea.hbm %s182_s0, 16 }
   0x2   :  { %s15_s10 = sshll.u32 %s138_s9, 4  ;;  %p91_p0 = scmp.ne.s32.totalorder %s182_s0, %s90_s13  ;;  %s16_s10 = int_to_ptr.vmem [resolvable:$true] %s15_s10 }
   0x3   :  { %p94_p1 = scmp.lt.u32.totalorder %s90_s13, %s182_s0 }
   0x5   :  { %p96_p2 = pnand %p94_p1, %p91_p0 }
   0x7   :  { %99 = shalt.err (!%p96_p2)
}
   0x8   :  { %s100_s18 = scalar_lea.vmem %s16_s10, 16  ;;  %s104_s19 = scalar_lea.vmem %s16_s10, 32 }
   0x9   :  { %p101_p3 = scmp.ne.s32.totalorder %s16_s10, %s100_s18  ;;  %p105_p4 = scmp.lt.s32.totalorder %s16_s10, %s16_s10 }
   0xa   :  { %p106_p5 = scmp.lt.s32.totalorder %s104_s19, %s100_s18 }
   0xc   :  { %p107_p6 = por %p106_p5, %p105_p4 }
   0xe   :  { %p108_p7 = pnand %p107_p6, %p101_p3 }
  0x10   :  { %111 = shalt.err (!%p108_p7)
}
  0x11   :  { %18 = dma.hbm_to_vmem [thread:$0]  %s182_s0, 16, %s16_s10, [#allocation3]  }
  0x12   :  { %134 = dma.done.wait [#allocation3], 16  }
  0x13   :  { %135 = vsyncadd [#allocation3], 4294967280  ;;  %v37_v0 = vlaneseq  ;;  %v24_v2 = vld [vmem:[#allocation2] sm:$0x1]  ;;  %s139_s0 = smov [#allocation5]  }
  0x14   :  { %v25_v3 = vld [vmem:[%s183_s1] sm:$0x1]  ;;  %v29_v6 = vsub.f32 1.0, %v24_v2  ;;  %v31_v7 = vmax.f32 %v24_v2, 0.0  ;;  %s79_s24 = sshll.u32 %s139_s0, 4  ;;  %s80_s24 = int_to_ptr.vmem [resolvable:$true] %s79_s24 }
  0x15   :  { %v64_v1 = vshrl.u32 %v37_v0, 7  ;;  %v38_v4 = vand.u32 127, %v37_v0  ;;  %v26_v5 = vunpack.c.0.s8 %v25_v3  ;;  %s112_s1 = scalar_lea.vmem %s80_s24, 16  ;;  %s116_s25 = scalar_lea.vmem %s80_s24, 32 }
  0x16   :  { %p113_p8 = scmp.ne.s32.totalorder %s80_s24, %s112_s1  ;;  %p117_p9 = scmp.lt.s32.totalorder %s80_s24, %s80_s24 }
  0x17   :  { %v67_v8 = vmul.u32 128, %v64_v1  ;;  %v27_v9 = vcvt.s32.f32 %v26_v5  ;;  %v43_v10 = vand.u32 1, %v38_v4  ;;  %p118_p10 = scmp.lt.s32.totalorder %s116_s25, %s112_s1 }
  0x19   :  { %v28_v11 = vsub.f32 1.0, %v27_v9  ;;  %v32_v12 = vmul.f32 %v31_v7, %v27_v9  ;;  %v35_v13 = vmul.f32 %v29_v6, %v27_v9  ;;  %v68_v14 = vadd.s32 %v67_v8, %v38_v4  ;;  %p119_p11 = por %p118_p10, %p117_p9 }
  0x1a   :  { %vm51_vm0 = vcmp.eq.s32.totalorder %v43_v10, 0 }
  0x1b   :  { %v30_v15 = vmul.f32 %v29_v6, %v28_v11  ;;  %v34_v16 = vmul.f32 %v31_v7, %v28_v11  ;;  %vm69_vm1 = vcmp.lt.s32.totalorder %v68_v14, 16  ;;  %p120_p12 = pnand %p119_p11, %p113_p8 }
  0x1d   :  { %v33_v17 = vadd.f32 %v32_v12, %v30_v15  ;;  %v36_v18 = vadd.f32 %v35_v13, %v34_v16 }
  0x1f   :  { %v52_v19 = vsel %vm51_vm0, %v33_v17, %v36_v18 }
  0x20   :  { %v70_v20 = vsel %vm69_vm1, %v52_v19, 0.0 }
  0x21   :  { %72 = vst [vmem:[#allocation5] sm:$0x1] %v70_v20 }
  0x22   :  { %123 = shalt.err (!%p120_p12)
}
  0x23   :  { %s124_s28 = scalar_lea.hbm %s184_s2, 16 }
  0x24   :  { %p125_p13 = scmp.ne.s32.totalorder %s184_s2, %s124_s28  ;;  %p128_p0 = scmp.lt.u32.totalorder %s124_s28, %s184_s2 }
  0x26   :  { %p130_p1 = pnand %p128_p0, %p125_p13 }
  0x28   :  { %133 = shalt.err (!%p130_p1)
}
  0x29   :  { %82 = dma.vmem_to_hbm [thread:$0]  %s80_s24, 16, %s184_s2, [#allocation4]  }
  0x2a   :  { %136 = dma.done.wait [#allocation4], 16  }
  0x2b   :  { %137 = vsyncadd [#allocation4], 4294967280 }
  0x2c   :  { %86 = vsyncpa [#allocation3], 1 }
  0x2d   :  { %87 = vsyncpa [#allocation4], 1 }

</bundles_post_ra>
